<compile_context>
chip_gen: v7x
topology: tpu7x:2x2x1
jax: 0.10.0
libtpu: 0.0.40
codegen_flags: <defaults>
</compile_context>

<pallas_src>
import jax
import jax.numpy as jnp
from jax import lax
from jax.experimental import pallas as pl
from jax.experimental.pallas import tpu as pltpu


def _round_up(x, m):
    return (x + m - 1) // m * m


def _dwsep_kernel(xph_ref, dww_ref, pww_ref, bias_ref, out_ref):
    # xph_ref:  (1, 4, Hq, Wq, Cp)  stride-2 phase-decomposed, SAME-padded, lane-padded input
    #           phase p = 2*(row parity) + (col parity); plane row q maps to padded row 2q+parity
    # dww_ref:  (9, Cp)             depthwise 3x3 taps, flattened (dy*3+dx), channels on lanes
    # pww_ref:  (Cp, Cop)           1x1 pointwise weights
    # bias_ref: (1, Cop)            fused bias = dw_bias @ pw_weight + pw_bias
    # out_ref:  (1, Ho, Wo, Cop)
    _, Ho, Wo, Cop = out_ref.shape
    Cp = dww_ref.shape[1]
    K = 3

    # ---- depthwise 3x3, stride 2: 9 lane-dense VPU FMAs, accumulated in vregs ----
    acc = None
    for dy in range(K):
        qy, ry = dy // 2, dy % 2
        for dx in range(K):
            qx, rx = dx // 2, dx % 2
            # padded input row 2*oy+dy  ==  phase ry, plane row oy+qy  -> unit-stride slice
            tap = xph_ref[0, ry * 2 + rx, qy:qy + Ho, qx:qx + Wo, :].astype(jnp.float32)
            w = dww_ref[dy * K + dx:dy * K + dx + 1, :].astype(jnp.float32)  # (1, Cp), bcast
            term = tap * w
            acc = term if acc is None else acc + term

    # ---- pointwise 1x1 conv on the MXU: (Ho*Wo, Cp) @ (Cp, Cop), both lane-dense ----
    y = jnp.dot(acc.reshape(Ho * Wo, Cp),
                pww_ref[...].astype(jnp.float32),
                preferred_element_type=jnp.float32)
    y = y + bias_ref[...].astype(jnp.float32)                  # fused dw+pw bias (1, Cop)
    out_ref[0] = y.reshape(Ho, Wo, Cop).astype(out_ref.dtype)


def depthwiseconv1_pallas(x_nchw, dw_weight, dw_bias, pw_weight, pw_bias, *, lane=128):
    """Forward pass of depthwiseconv1.

    x_nchw:    (N, Cin, H, W)
    dw_weight: (Cin, 1, 3, 3)    depthwise conv weight (groups=Cin, stride=2, pad=1)
    dw_bias:   (Cin,)
    pw_weight: (Cout, Cin, 1, 1) pointwise conv weight
    pw_bias:   (Cout,)
    returns    (N, Cout, Ho, Wo) with Ho = (H+2-3)//2 + 1
    """
    N, Cin, H, W = x_nchw.shape
    Cout = pw_weight.shape[0]
    K, S, P = 3, 2, 1
    Ho = (H + 2 * P - K) // S + 1
    Wo = (W + 2 * P - K) // S + 1
    Cp = _round_up(Cin, lane)
    Cop = _round_up(Cout, lane)
    Hq, Wq = Ho + 1, Wo + 1      # phase-plane extents (cover tap offsets 0..2 at stride 2)

    # ---- single fused prep pass (NCHW->NHWC + channel pad + SAME pad + phase split) ----
    x = jnp.transpose(x_nchw, (0, 2, 3, 1))                               # (N, H, W, Cin)
    x = jnp.pad(x, ((0, 0),
                    (P, 2 * Hq - P - H),
                    (P, 2 * Wq - P - W),
                    (0, Cp - Cin)))                                       # (N, 2Hq, 2Wq, Cp)
    xph = x.reshape(N, Hq, 2, Wq, 2, Cp).transpose(0, 2, 4, 1, 3, 5)      # (N, 2, 2, Hq, Wq, Cp)
    xph = xph.reshape(N, 4, Hq, Wq, Cp)

    # ---- weights: channels on the 128-lane axis, zero-padded ----
    dww = jnp.pad(jnp.transpose(dw_weight[:, 0], (1, 2, 0)),
                  ((0, 0), (0, 0), (0, Cp - Cin)))                        # (K, K, Cp)
    dww = dww.reshape(K * K, Cp)                                          # (9, Cp)
    pww = jnp.pad(jnp.transpose(pw_weight[:, :, 0, 0], (1, 0)),
                  ((0, Cp - Cin), (0, Cop - Cout)))                       # (Cp, Cop)
    # fold depthwise bias through the pointwise conv:  (x+dwb) W + pwb = x W + (dwb W + pwb)
    dwb = jnp.pad(dw_bias, (0, Cp - Cin)).reshape(1, Cp).astype(jnp.float32)
    pwb = jnp.pad(pw_bias, (0, Cop - Cout)).reshape(1, Cop).astype(jnp.float32)
    fused_bias = jnp.dot(dwb, pww.astype(jnp.float32),
                         preferred_element_type=jnp.float32) + pwb        # (1, Cop)

    out = pl.pallas_call(
        _dwsep_kernel,
        out_shape=jax.ShapeDtypeStruct((N, Ho, Wo, Cop), x_nchw.dtype),
        grid_spec=pltpu.PrefetchScalarGridSpec(
            num_scalar_prefetch=0,
            grid=(N,),
            in_specs=[
                pl.BlockSpec((1, 4, Hq, Wq, Cp), lambda n: (n, 0, 0, 0, 0)),
                pl.BlockSpec((K * K, Cp), lambda n: (0, 0)),
                pl.BlockSpec((Cp, Cop), lambda n: (0, 0)),
                pl.BlockSpec((1, Cop), lambda n: (0, 0)),
            ],
            out_specs=pl.BlockSpec((1, Ho, Wo, Cop), lambda n: (n, 0, 0, 0)),
        ),
        compiler_params=pltpu.CompilerParams(
            dimension_semantics=("parallel",),   # shard batch steps across TCs on v7x
        ),
    )(xph, dww, pww, fused_bias)

    # strip channel padding, back to NCHW
    return jnp.transpose(out[..., :Cout], (0, 3, 1, 2))


def depthwiseconv1_reference(x, dw_weight, dw_bias, pw_weight, pw_bias):
    """Pure-JAX reference via lax.conv_general_dilated (NCHW, OIHW)."""
    Cin = x.shape[1]
    y = lax.conv_general_dilated(
        x, dw_weight, window_strides=(2, 2), padding=[(1, 1), (1, 1)],
        feature_group_count=Cin,
        dimension_numbers=('NCHW', 'OIHW', 'NCHW'),
        precision=lax.Precision.HIGHEST)
    y = y + dw_bias.reshape(1, -1, 1, 1)
    y = lax.conv_general_dilated(
        y, pw_weight, window_strides=(1, 1), padding=[(0, 0), (0, 0)],
        dimension_numbers=('NCHW', 'OIHW', 'NCHW'),
        precision=lax.Precision.HIGHEST)
    return y + pw_bias.reshape(1, -1, 1, 1)


if __name__ == "__main__":
    # Small shapes consistent with the module: depthwiseconv1(in_ch=8, out_ch=16)
    N, in_ch, out_ch, H, W = 2, 8, 16, 16, 16

    key = jax.random.PRNGKey(0)
    kx, kdw, kdb, kpw, kpb = jax.random.split(key, 5)
    x = jax.random.normal(kx, (N, in_ch, H, W), dtype=jnp.float32)
    dw_weight = 0.1 * jax.random.normal(kdw, (in_ch, 1, 3, 3), dtype=jnp.float32)
    dw_bias = 0.1 * jax.random.normal(kdb, (in_ch,), dtype=jnp.float32)
    pw_weight = 0.1 * jax.random.normal(kpw, (out_ch, in_ch, 1, 1), dtype=jnp.float32)
    pw_bias = 0.1 * jax.random.normal(kpb, (out_ch,), dtype=jnp.float32)

    out = depthwiseconv1_pallas(x, dw_weight, dw_bias, pw_weight, pw_bias)
    out = jax.block_until_ready(out)

    ref = depthwiseconv1_reference(x, dw_weight, dw_bias, pw_weight, pw_bias)
    assert out.shape == (N, out_ch, H // 2, W // 2), out.shape
    err = jnp.max(jnp.abs(out - ref))
    assert jnp.allclose(out, ref, atol=1e-3, rtol=1e-3), f"max abs err {err}"

    print("KERNEL_OK")
</pallas_src>

<mosaic_0001>
module attributes {stable_mosaic.version = 11 : i64} {
  func.func @_dwsep_kernel(%arg0: i32, %arg1: memref<1x4x9x9x128xf32, #tpu.memory_space<vmem>>, %arg2: memref<9x128xf32, #tpu.memory_space<vmem>>, %arg3: memref<128x128xf32, #tpu.memory_space<vmem>>, %arg4: memref<1x128xf32, #tpu.memory_space<vmem>>, %arg5: memref<1x8x8x128xf32, #tpu.memory_space<vmem>>) attributes {dimension_semantics = [#tpu.dimension_semantics<parallel>], iteration_bounds = array<i64: 2>, scalar_prefetch = 0 : i64, scratch_operands = 0 : i64, tpu.core_type = #tpu.core_type<tc>, window_params = [{transform_indices = @transform_0, window_bounds = array<i64: 1, 4, 9, 9, 128>}, {pipeline_mode = #tpu.pipeline_mode<synchronous>, transform_indices = @transform_1, window_bounds = array<i64: 9, 128>}, {pipeline_mode = #tpu.pipeline_mode<synchronous>, transform_indices = @transform_2, window_bounds = array<i64: 128, 128>}, {pipeline_mode = #tpu.pipeline_mode<synchronous>, transform_indices = @transform_3, window_bounds = array<i64: 1, 128>}, {transform_indices = @transform_4, window_bounds = array<i64: 1, 8, 8, 128>}]} {
    %c0 = arith.constant 0 : index
    %c0_0 = arith.constant 0 : index
    %c0_1 = arith.constant 0 : index
    %c0_2 = arith.constant 0 : index
    %c0_3 = arith.constant 0 : index
    %0 = vector.load %arg1[%c0, %c0_0, %c0_1, %c0_2, %c0_3] : memref<1x4x9x9x128xf32, #tpu.memory_space<vmem>>, vector<1x1x8x8x128xf32>
    %1 = vector.shape_cast %0 : vector<1x1x8x8x128xf32> to vector<8x8x128xf32>
    %c0_4 = arith.constant 0 : index
    %c0_5 = arith.constant 0 : index
    %2 = vector.load %arg2[%c0_4, %c0_5] : memref<9x128xf32, #tpu.memory_space<vmem>>, vector<1x128xf32>
    %3 = vector.shape_cast %2 : vector<1x128xf32> to vector<1x1x128xf32>
    %4 = vector.broadcast %3 : vector<1x1x128xf32> to vector<8x8x128xf32>
    %5 = arith.mulf %1, %4 : vector<8x8x128xf32>
    %c0_6 = arith.constant 0 : index
    %c1 = arith.constant 1 : index
    %c0_7 = arith.constant 0 : index
    %c0_8 = arith.constant 0 : index
    %c0_9 = arith.constant 0 : index
    %6 = vector.load %arg1[%c0_6, %c1, %c0_7, %c0_8, %c0_9] : memref<1x4x9x9x128xf32, #tpu.memory_space<vmem>>, vector<1x1x8x8x128xf32>
    %7 = vector.shape_cast %6 : vector<1x1x8x8x128xf32> to vector<8x8x128xf32>
    %c1_10 = arith.constant 1 : index
    %c0_11 = arith.constant 0 : index
    %8 = vector.load %arg2[%c1_10, %c0_11] : memref<9x128xf32, #tpu.memory_space<vmem>>, vector<1x128xf32>
    %9 = vector.shape_cast %8 : vector<1x128xf32> to vector<1x1x128xf32>
    %10 = vector.broadcast %9 : vector<1x1x128xf32> to vector<8x8x128xf32>
    %11 = arith.mulf %7, %10 : vector<8x8x128xf32>
    %12 = arith.addf %5, %11 : vector<8x8x128xf32>
    %c0_12 = arith.constant 0 : index
    %c0_13 = arith.constant 0 : index
    %c0_14 = arith.constant 0 : index
    %c1_15 = arith.constant 1 : index
    %c0_16 = arith.constant 0 : index
    %13 = vector.load %arg1[%c0_12, %c0_13, %c0_14, %c1_15, %c0_16] : memref<1x4x9x9x128xf32, #tpu.memory_space<vmem>>, vector<1x1x8x8x128xf32>
    %14 = vector.shape_cast %13 : vector<1x1x8x8x128xf32> to vector<8x8x128xf32>
    %c2 = arith.constant 2 : index
    %c0_17 = arith.constant 0 : index
    %15 = vector.load %arg2[%c2, %c0_17] : memref<9x128xf32, #tpu.memory_space<vmem>>, vector<1x128xf32>
    %16 = vector.shape_cast %15 : vector<1x128xf32> to vector<1x1x128xf32>
    %17 = vector.broadcast %16 : vector<1x1x128xf32> to vector<8x8x128xf32>
    %18 = arith.mulf %14, %17 : vector<8x8x128xf32>
    %19 = arith.addf %12, %18 : vector<8x8x128xf32>
    %c0_18 = arith.constant 0 : index
    %c2_19 = arith.constant 2 : index
    %c0_20 = arith.constant 0 : index
    %c0_21 = arith.constant 0 : index
    %c0_22 = arith.constant 0 : index
    %20 = vector.load %arg1[%c0_18, %c2_19, %c0_20, %c0_21, %c0_22] : memref<1x4x9x9x128xf32, #tpu.memory_space<vmem>>, vector<1x1x8x8x128xf32>
    %21 = vector.shape_cast %20 : vector<1x1x8x8x128xf32> to vector<8x8x128xf32>
    %c3 = arith.constant 3 : index
    %c0_23 = arith.constant 0 : index
    %22 = vector.load %arg2[%c3, %c0_23] : memref<9x128xf32, #tpu.memory_space<vmem>>, vector<1x128xf32>
    %23 = vector.shape_cast %22 : vector<1x128xf32> to vector<1x1x128xf32>
    %24 = vector.broadcast %23 : vector<1x1x128xf32> to vector<8x8x128xf32>
    %25 = arith.mulf %21, %24 : vector<8x8x128xf32>
    %26 = arith.addf %19, %25 : vector<8x8x128xf32>
    %c0_24 = arith.constant 0 : index
    %c3_25 = arith.constant 3 : index
    %c0_26 = arith.constant 0 : index
    %c0_27 = arith.constant 0 : index
    %c0_28 = arith.constant 0 : index
    %27 = vector.load %arg1[%c0_24, %c3_25, %c0_26, %c0_27, %c0_28] : memref<1x4x9x9x128xf32, #tpu.memory_space<vmem>>, vector<1x1x8x8x128xf32>
    %28 = vector.shape_cast %27 : vector<1x1x8x8x128xf32> to vector<8x8x128xf32>
    %c4 = arith.constant 4 : index
    %c0_29 = arith.constant 0 : index
    %29 = vector.load %arg2[%c4, %c0_29] : memref<9x128xf32, #tpu.memory_space<vmem>>, vector<1x128xf32>
    %30 = vector.shape_cast %29 : vector<1x128xf32> to vector<1x1x128xf32>
    %31 = vector.broadcast %30 : vector<1x1x128xf32> to vector<8x8x128xf32>
    %32 = arith.mulf %28, %31 : vector<8x8x128xf32>
    %33 = arith.addf %26, %32 : vector<8x8x128xf32>
    %c0_30 = arith.constant 0 : index
    %c2_31 = arith.constant 2 : index
    %c0_32 = arith.constant 0 : index
    %c1_33 = arith.constant 1 : index
    %c0_34 = arith.constant 0 : index
    %34 = vector.load %arg1[%c0_30, %c2_31, %c0_32, %c1_33, %c0_34] : memref<1x4x9x9x128xf32, #tpu.memory_space<vmem>>, vector<1x1x8x8x128xf32>
    %35 = vector.shape_cast %34 : vector<1x1x8x8x128xf32> to vector<8x8x128xf32>
    %c5 = arith.constant 5 : index
    %c0_35 = arith.constant 0 : index
    %36 = vector.load %arg2[%c5, %c0_35] : memref<9x128xf32, #tpu.memory_space<vmem>>, vector<1x128xf32>
    %37 = vector.shape_cast %36 : vector<1x128xf32> to vector<1x1x128xf32>
    %38 = vector.broadcast %37 : vector<1x1x128xf32> to vector<8x8x128xf32>
    %39 = arith.mulf %35, %38 : vector<8x8x128xf32>
    %40 = arith.addf %33, %39 : vector<8x8x128xf32>
    %c0_36 = arith.constant 0 : index
    %c0_37 = arith.constant 0 : index
    %c1_38 = arith.constant 1 : index
    %c0_39 = arith.constant 0 : index
    %c0_40 = arith.constant 0 : index
    %41 = vector.load %arg1[%c0_36, %c0_37, %c1_38, %c0_39, %c0_40] : memref<1x4x9x9x128xf32, #tpu.memory_space<vmem>>, vector<1x1x8x8x128xf32>
    %42 = vector.shape_cast %41 : vector<1x1x8x8x128xf32> to vector<8x8x128xf32>
    %c6 = arith.constant 6 : index
    %c0_41 = arith.constant 0 : index
    %43 = vector.load %arg2[%c6, %c0_41] : memref<9x128xf32, #tpu.memory_space<vmem>>, vector<1x128xf32>
    %44 = vector.shape_cast %43 : vector<1x128xf32> to vector<1x1x128xf32>
    %45 = vector.broadcast %44 : vector<1x1x128xf32> to vector<8x8x128xf32>
    %46 = arith.mulf %42, %45 : vector<8x8x128xf32>
    %47 = arith.addf %40, %46 : vector<8x8x128xf32>
    %c0_42 = arith.constant 0 : index
    %c1_43 = arith.constant 1 : index
    %c1_44 = arith.constant 1 : index
    %c0_45 = arith.constant 0 : index
    %c0_46 = arith.constant 0 : index
    %48 = vector.load %arg1[%c0_42, %c1_43, %c1_44, %c0_45, %c0_46] : memref<1x4x9x9x128xf32, #tpu.memory_space<vmem>>, vector<1x1x8x8x128xf32>
    %49 = vector.shape_cast %48 : vector<1x1x8x8x128xf32> to vector<8x8x128xf32>
    %c7 = arith.constant 7 : index
    %c0_47 = arith.constant 0 : index
    %50 = vector.load %arg2[%c7, %c0_47] : memref<9x128xf32, #tpu.memory_space<vmem>>, vector<1x128xf32>
    %51 = vector.shape_cast %50 : vector<1x128xf32> to vector<1x1x128xf32>
    %52 = vector.broadcast %51 : vector<1x1x128xf32> to vector<8x8x128xf32>
    %53 = arith.mulf %49, %52 : vector<8x8x128xf32>
    %54 = arith.addf %47, %53 : vector<8x8x128xf32>
    %c0_48 = arith.constant 0 : index
    %c0_49 = arith.constant 0 : index
    %c1_50 = arith.constant 1 : index
    %c1_51 = arith.constant 1 : index
    %c0_52 = arith.constant 0 : index
    %55 = vector.load %arg1[%c0_48, %c0_49, %c1_50, %c1_51, %c0_52] : memref<1x4x9x9x128xf32, #tpu.memory_space<vmem>>, vector<1x1x8x8x128xf32>
    %56 = vector.shape_cast %55 : vector<1x1x8x8x128xf32> to vector<8x8x128xf32>
    %c8 = arith.constant 8 : index
    %c0_53 = arith.constant 0 : index
    %57 = vector.load %arg2[%c8, %c0_53] : memref<9x128xf32, #tpu.memory_space<vmem>>, vector<1x128xf32>
    %58 = vector.shape_cast %57 : vector<1x128xf32> to vector<1x1x128xf32>
    %59 = vector.broadcast %58 : vector<1x1x128xf32> to vector<8x8x128xf32>
    %60 = arith.mulf %56, %59 : vector<8x8x128xf32>
    %61 = arith.addf %54, %60 : vector<8x8x128xf32>
    %62 = vector.shape_cast %61 : vector<8x8x128xf32> to vector<64x128xf32>
    %c0_54 = arith.constant 0 : index
    %c0_55 = arith.constant 0 : index
    %63 = vector.load %arg3[%c0_54, %c0_55] : memref<128x128xf32, #tpu.memory_space<vmem>>, vector<128x128xf32>
    %cst = arith.constant dense<0.000000e+00> : vector<64x128xf32>
    %64 = tpu.matmul %62, %63, %cst {dimension_numbers = #tpu.dot_dimension_numbers<[1], [0], [0], [1], [0, 0, 1, 1], [], []>} : vector<64x128xf32>, vector<128x128xf32>, vector<64x128xf32> -> vector<64x128xf32>
    %c0_56 = arith.constant 0 : index
    %c0_57 = arith.constant 0 : index
    %65 = vector.load %arg4[%c0_56, %c0_57] : memref<1x128xf32, #tpu.memory_space<vmem>>, vector<1x128xf32>
    %66 = vector.broadcast %65 : vector<1x128xf32> to vector<64x128xf32>
    %67 = arith.addf %64, %66 : vector<64x128xf32>
    %68 = vector.shape_cast %67 : vector<64x128xf32> to vector<8x8x128xf32>
    %c0_58 = arith.constant 0 : index
    %c0_59 = arith.constant 0 : index
    %c0_60 = arith.constant 0 : index
    %c0_61 = arith.constant 0 : index
    %69 = vector.load %arg5[%c0_58, %c0_59, %c0_60, %c0_61] : memref<1x8x8x128xf32, #tpu.memory_space<vmem>>, vector<1x8x8x128xf32>
    %70 = vector.shape_cast %69 : vector<1x8x8x128xf32> to vector<8x8x128xf32>
    %71 = vector.shape_cast %68 : vector<8x8x128xf32> to vector<1x8x8x128xf32>
    tpu.vector_store %arg5[%c0_58, %c0_59, %c0_60, %c0_61], %71 {strides = array<i32>} : memref<1x8x8x128xf32, #tpu.memory_space<vmem>>, vector<1x8x8x128xf32>,
    return
  }
  func.func @transform_0(%arg0: i32) -> (i32, i32, i32, i32, i32) {
    %c0_i32 = arith.constant 0 : i32
    %c0_i32_0 = arith.constant 0 : i32
    %c0_i32_1 = arith.constant 0 : i32
    %c0_i32_2 = arith.constant 0 : i32
    %c0_i32_3 = arith.constant 0 : i32
    return %arg0, %c0_i32, %c0_i32_0, %c0_i32_1, %c0_i32_2 : i32, i32, i32, i32, i32
  }
  func.func @transform_1(%arg0: i32) -> (i32, i32) {
    %c0_i32 = arith.constant 0 : i32
    %c0_i32_0 = arith.constant 0 : i32
    %c0_i32_1 = arith.constant 0 : i32
    return %c0_i32, %c0_i32_0 : i32, i32
  }
  func.func @transform_2(%arg0: i32) -> (i32, i32) {
    %c0_i32 = arith.constant 0 : i32
    %c0_i32_0 = arith.constant 0 : i32
    %c0_i32_1 = arith.constant 0 : i32
    return %c0_i32, %c0_i32_0 : i32, i32
  }
  func.func @transform_3(%arg0: i32) -> (i32, i32) {
    %c0_i32 = arith.constant 0 : i32
    %c0_i32_0 = arith.constant 0 : i32
    %c0_i32_1 = arith.constant 0 : i32
    return %c0_i32, %c0_i32_0 : i32, i32
  }
  func.func @transform_4(%arg0: i32) -> (i32, i32, i32, i32) {
    %c0_i32 = arith.constant 0 : i32
    %c0_i32_0 = arith.constant 0 : i32
    %c0_i32_1 = arith.constant 0 : i32
    %c0_i32_2 = arith.constant 0 : i32
    return %arg0, %c0_i32, %c0_i32_0, %c0_i32_1 : i32, i32, i32, i32
  }
}

</mosaic_0001>

<bundles_post_ra>
// kernel: tpu_custom_call.1
= control target key start
LH: loop header
LB: loop body
LE: loop exit
PB: predicated region body
PF: predicated region fallthrough
CT: control target
= control target key end

     0   :  { %9 = vsyncpa [#allocation3], 0  ;;  %s1358_s0 = inlined_call_operand.vmem [shape: f32[2,4,9,9,128], index: 0, kind: input, shape index: {}]   ;;  %s1359_s1 = inlined_call_operand.vmem [shape: f32[9,128], index: 1, kind: input, shape index: {}]   ;;  %s1360_s2 = inlined_call_operand.vmem [shape: f32[128,128], index: 2, kind: input, shape index: {}]   ;;  %s1361_s3 = inlined_call_operand.vmem [shape: f32[1,128], index: 3, kind: input, shape index: {}]   ;;  %s1362_s4 = inlined_call_operand.hbm [shape: f32[2,8,8,128], index: 4, kind: output, shape index: {}]  }
   0x1   :  { %11 = vsyncpa [#allocation3 + $0x1], 0  ;;  %s994_s15 = smov 0   ;;  %s996_s16 = smov 0  }
   0x2   :  { %s998_s17 = smov 0   ;;  %s1000_s18 = smov 0  }
   0x3 LB: > { %s1015_s19 = sadd.s32 4294967295, %s964_s18   ;;  %s666_s20 = sadd.s32 4294967294, %s964_s18   ;;  %s964_s18 = sphi %s1000_s18, %s1368_s18   ;;  %s960_s17 = sphi %s998_s17, %s1367_s17   ;;  %s956_s16 = sphi %s996_s16, %s1366_s16   ;;  %s952_s15 = sphi %s994_s15, %s1365_s15  }
   0x4   : > { %s1019_s21 = sadd.s32 1, %s964_s18   ;;  %s113_s22 = sadd.s32 1, %s960_s17 }
   0x5   : > { %s110_s23 = ssub.s32 %s964_s18, %s1019_s21  ;;  %p123_p0 = scmp.ne.s32.totalorder %s960_s17, %s956_s16 }
   0x6   : > { %p111_p1 = scmp.eq.s32.totalorder %s110_s23, 0  ;;  %p124_p2 = scmp.eq.s32.totalorder %s1015_s19, 1 }
   0x7   : > { %p129_p3 = scmp.ne.s32.totalorder %s956_s16, %s952_s15  ;;  %p130_p4 = scmp.eq.s32.totalorder %s666_s20, 1 }
   0x8   : > { %s1030_s24 = scalar_select %p111_p1, %s960_s17, %s113_s22  }
   0x9   : > { %p1032_p5 = por %p124_p2, %p123_p0  ;;  %p1036_p6 = por %p130_p4, %p129_p3 }
   0xa   : > { %p669_p7 = scmp.ge.s32.totalorder %s964_s18, 1  ;;  %p165_p8 = scmp.lt.s32.totalorder %s964_s18, 3 }
   0xc   : > { %p166_p9 = pnand %p669_p7, %p165_p8 }
   0xd   : > { %v454_v0 = vld [vmem:[%s1360_s2] sm:$0xff] (!%p166_p9)  ;;  %v455_v1 = vld [vmem:[%s1360_s2 + $0x8] sm:$0xff] (!%p166_p9)  ;;  %v456_v2 = vld [vmem:[%s1360_s2 + $0x10] sm:$0xff] (!%p166_p9)  ;;  %p191_p10 = scmp.lt.s32.totalorder (!%p166_p9), %s1015_s19, 1  ;;  %s188_s6 = sand.u32 (!%p166_p9), 1, %s956_s16  }
   0xe   : > { %169 = sbr.rel (%p166_p9) target bundleno = 302 (0x12e), region = 36  ;;  %v812_v3 = vpack.c.bf16 (!%p166_p9), %v455_v1, %v454_v0  ;;  %v457_v4 = vld [vmem:[%s1360_s2 + $0x18] sm:$0xff] (!%p166_p9)  ;;  %v458_v6 = vld [vmem:[%s1360_s2 + $0x20] sm:$0xff] (!%p166_p9)  ;;  %v459_v7 = vld [vmem:[%s1360_s2 + $0x28] sm:$0xff] (!%p166_p9)  ;;  %s670_s7 = sshll.u32 (!%p166_p9), %s188_s6, 6 }
   0xf   : > { %v816_v5 = vpack.c.bf16 (!%p166_p9), %v457_v4, %v456_v2  ;;  %v460_v8 = vld [vmem:[%s1360_s2 + $0x30] sm:$0xff] (!%p166_p9)  ;;  %v461_v9 = vld [vmem:[%s1360_s2 + $0x38] sm:$0xff] (!%p166_p9)  ;;  %v462_v10 = vld [vmem:[%s1360_s2 + $0x40] sm:$0xff] (!%p166_p9)  ;;  %v820_v12 = vpack.c.bf16 (!%p166_p9), %v459_v7, %v458_v6  ;;  %s743_s11 = sshll.u32 (!%p166_p9), %s1015_s19, 10  ;;  %s966_s22 = smov (!%p166_p9), [#allocation2]  }
  0x10   : > { %813 = vmatprep.subr.bf16.mxu0 (!%p166_p9), %v812_v3  ;;  %844 = vmatprep.subr.bf16.mxu1 (!%p166_p9), %v812_v3  ;;  %v463_v11 = vld [vmem:[%s1360_s2 + $0x48] sm:$0xff] (!%p166_p9)  ;;  %v464_v13 = vld [vmem:[%s1360_s2 + $0x50] sm:$0xff] (!%p166_p9)  ;;  %v465_v14 = vld [vmem:[%s1360_s2 + $0x58] sm:$0xff] (!%p166_p9)  ;;  %v824_v33 = vpack.c.bf16 (!%p166_p9), %v461_v9, %v460_v8  ;;  %s906_s23 = sshll.u32 (!%p166_p9), %s966_s22, 4  ;;  %s907_s23 = int_to_ptr.vmem [resolvable:$false] %s906_s23 }
  0x11   : > { %815 = vmatpush3.bf16.msra.mxu0 (!%p166_p9), %v812_v3  ;;  %852 = vmatpush3.bf16.msra.mxu1 (!%p166_p9), %v812_v3  ;;  %v466_v15 = vld [vmem:[%s1360_s2 + $0x60] sm:$0xff] (!%p166_p9)  ;;  %v467_v16 = vld [vmem:[%s1360_s2 + $0x68] sm:$0xff] (!%p166_p9)  ;;  %v468_v19 = vld [vmem:[%s1360_s2 + $0x70] sm:$0xff] (!%p166_p9)  ;;  %v1131_v34 = vpack.c.bf16 (!%p166_p9), %v463_v11, %v462_v10  ;;  %v1144_v38 = vpack.c.bf16 (!%p166_p9), %v465_v14, %v464_v13  ;;  %s908_s27 = scalar_lea.vmem (!%p166_p9), %s907_s23, 2048 }
  0x12   : > { %817 = vmatprep.subr.bf16.mxu0 (!%p166_p9), %v816_v5  ;;  %845 = vmatprep.subr.bf16.mxu1 (!%p166_p9), %v816_v5  ;;  %v1089_v17 = vld [vmem:[%s1359_s1] ss:$0 sm:$0xff] (!%p166_p9)  ;;  %v1094_v18 = vld [vmem:[%s1359_s1 + $0x1] ss:$0 sm:$0xff] (!%p166_p9)  ;;  %v469_v20 = vld [vmem:[%s1360_s2 + $0x78] sm:$0xff] (!%p166_p9)  ;;  %v1146_v39 = vpack.c.bf16 (!%p166_p9), %v467_v16, %v466_v15 }
  0x13   : > { %v1110_v21 = vld [vmem:[%s1359_s1 + $0x2] ss:$0 sm:$0xff] (!%p166_p9)  ;;  %v1115_v22 = vld [vmem:[%s1359_s1 + $0x3] ss:$0 sm:$0xff] (!%p166_p9)  ;;  %v1120_v23 = vld [vmem:[%s1359_s1 + $0x4] ss:$0 sm:$0xff] (!%p166_p9)  ;;  %v1156_v45 = vpack.c.bf16 (!%p166_p9), %v469_v20, %v468_v19 }
  0x14   : > { %v1136_v35 = vld [vmem:[%s1359_s1 + $0x5] ss:$0 sm:$0xff] (!%p166_p9)  ;;  %v1142_v37 = vld [vmem:[%s1359_s1 + $0x6] ss:$0 sm:$0xff] (!%p166_p9)  ;;  %v1153_v43 = vld [vmem:[%s1359_s1 + $0x7] ss:$0 sm:$0xff] (!%p166_p9) }
  0x15   : > { %s192_s13 = scalar_select %p191_p10, %s1015_s19, 1  ;;  %819 = vmatpush3.bf16.msra.mxu0 %v816_v5  ;;  %853 = vmatpush3.bf16.msra.mxu1 %v816_v5  ;;  %v1162_v47 = vld [vmem:[%s1359_s1 + $0x8] ss:$0 sm:$0xff] }
  0x16   : > { %821 = vmatprep.subr.bf16.mxu0 %v820_v12  ;;  %846 = vmatprep.subr.bf16.mxu1 %v820_v12  ;;  %s1317_s19 = scalar_lea.sflag [#allocation3], %s188_s6 }
  0x17   : > { %s860_s5 = smul.u32 576, %s192_s13 }
  0x19   : > { %s1105_s8 = scalar_lea.vmem %s1358_s0, %s860_s5  ;;  %823 = vmatpush3.bf16.msra.mxu0 %v820_v12  ;;  %854 = vmatpush3.bf16.msra.mxu1 %v820_v12  ;;  %s1311_s5 = scalar_lea.hbm %s1362_s4, %s743_s11 }
  0x1a   : > { %v196_v24 = vld [vmem:[%s1105_s8] sm:$0xff]  ;;  %v673_v25 = vld [vmem:[%s1105_s8 + $0x90] sm:$0xff]  ;;  %825 = vmatprep.subr.bf16.mxu0 %v824_v33  ;;  %847 = vmatprep.subr.bf16.mxu1 %v824_v33 }
  0x1b   : > { %v247_v26 = vld [vmem:[%s1105_s8 + $0x1] sm:$0xff]  ;;  %v209_v27 = vmul.f32 %v1089_v17, %v196_v24  ;;  %v231_v28 = vmul.f32 %v1094_v18, %v673_v25  ;;  %v692_v31 = vld [vmem:[%s1105_s8 + $0x1b0] sm:$0xff] }
  0x1c   : > { %v260_v29 = vmul.f32 %v1110_v21, %v247_v26  ;;  %v683_v30 = vld [vmem:[%s1105_s8 + $0x120] sm:$0xff]  ;;  %v710_v36 = vld [vmem:[%s1105_s8 + $0x10] sm:$0xff]  ;;  %v320_v46 = vmul.f32 %v1120_v23, %v692_v31 }
  0x1d   : > { %v701_v32 = vld [vmem:[%s1105_s8 + $0x121] sm:$0xff]  ;;  %v239_v40 = vadd.f32 %v231_v28, %v209_v27  ;;  %v290_v41 = vmul.f32 %v1115_v22, %v683_v30  ;;  %v728_v44 = vld [vmem:[%s1105_s8 + $0x11] sm:$0xff]  ;;  %v210_v50 = vmul.f32 %v710_v36, %v1089_v17  ;;  %v379_v63 = vmul.f32 %v1142_v37, %v710_v36  ;;  %827 = vmatpush3.bf16.msra.mxu0 %v824_v33 }
  0x1e   : > { %v719_v42 = vld [vmem:[%s1105_s8 + $0xa0] sm:$0xff]  ;;  %v1168_v49 = vld [vmem:[%s1105_s8 + $0xd0] sm:$0xff]  ;;  %v349_v53 = vmul.f32 %v1136_v35, %v701_v32  ;;  %v261_v61 = vmul.f32 %v728_v44, %v1110_v21  ;;  %v438_v1 = vmul.f32 %v1162_v47, %v728_v44  ;;  %855 = vmatpush3.bf16.msra.mxu1 %v824_v33  ;;  %829 = vmatprep.subr.bf16.mxu0 %v1131_v34 }
  0x1f   : > { %v1165_v48 = vld [vmem:[%s1105_s8 + $0x40] sm:$0xff]  ;;  %v232_v51 = vmul.f32 %v719_v42, %v1094_v18  ;;  %v268_v52 = vadd.f32 %v260_v29, %v239_v40  ;;  %v696_v57 = vld [vmem:[%s1105_s8 + $0x1f0] sm:$0xff]  ;;  %v235_v58 = vmul.f32 %v1094_v18, %v1168_v49  ;;  %v409_v0 = vmul.f32 %v1153_v43, %v719_v42  ;;  %848 = vmatprep.subr.bf16.mxu1 %v1131_v34 }
  0x20   : > { %v213_v54 = vmul.f32 %v1089_v17, %v1165_v48  ;;  %v1176_v55 = vld [vmem:[%s1105_s8 + $0x41] sm:$0xff]  ;;  %v684_v2 = vld [vmem:[%s1105_s8 + $0x130] sm:$0xff]  ;;  %v324_v6 = vmul.f32 %v1120_v23, %v696_v57 }
  0x21   : > { %v687_v56 = vld [vmem:[%s1105_s8 + $0x160] sm:$0xff]  ;;  %v264_v59 = vmul.f32 %v1110_v21, %v1176_v55  ;;  %v298_v62 = vadd.f32 %v290_v41, %v268_v52  ;;  %v240_v7 = vadd.f32 %v232_v51, %v210_v50  ;;  %v702_v8 = vld [vmem:[%s1105_s8 + $0x131] sm:$0xff]  ;;  %v291_v13 = vmul.f32 %v1115_v22, %v684_v2  ;;  %831 = vmatpush3.bf16.msra.mxu0 %v1131_v34 }
  0x22   : > { %v705_v60 = vld [vmem:[%s1105_s8 + $0x161] sm:$0xff]  ;;  %v243_v4 = vadd.f32 %v235_v58, %v213_v54  ;;  %v294_v5 = vmul.f32 %v1115_v22, %v687_v56  ;;  %v714_v11 = vld [vmem:[%s1105_s8 + $0x50] sm:$0xff]  ;;  %v350_v27 = vmul.f32 %v1136_v35, %v702_v8  ;;  %856 = vmatpush3.bf16.msra.mxu1 %v1131_v34  ;;  %833 = vmatprep.subr.bf16.mxu0 %v1144_v38 }
  0x23   : > { %v693_v3 = vld [vmem:[%s1105_s8 + $0x1c0] sm:$0xff]  ;;  %v328_v9 = vadd.f32 %v320_v46, %v298_v62  ;;  %v353_v10 = vmul.f32 %v1136_v35, %v705_v60  ;;  %v732_v15 = vld [vmem:[%s1105_s8 + $0x51] sm:$0xff]  ;;  %v269_v16 = vadd.f32 %v261_v61, %v240_v7  ;;  %v383_v26 = vmul.f32 %v1142_v37, %v714_v11  ;;  %849 = vmatprep.subr.bf16.mxu1 %v1144_v38 }
  0x24   : > { %v723_v12 = vld [vmem:[%s1105_s8 + $0xe0] sm:$0xff]  ;;  %v272_v14 = vadd.f32 %v264_v59, %v243_v4  ;;  %v321_v19 = vmul.f32 %v1120_v23, %v693_v3  ;;  %v688_v24 = vld [vmem:[%s1105_s8 + $0x170] sm:$0xff]  ;;  %v214_v31 = vmul.f32 %v714_v11, %v1089_v17  ;;  %v265_v36 = vmul.f32 %v732_v15, %v1110_v21 }
  0x25   : > { %v711_v20 = vld [vmem:[%s1105_s8 + $0x20] sm:$0xff]  ;;  %v357_v25 = vadd.f32 %v349_v53, %v328_v9  ;;  %v299_v30 = vadd.f32 %v291_v13, %v269_v16  ;;  %v236_v32 = vmul.f32 %v723_v12, %v1094_v18  ;;  %v295_v40 = vmul.f32 %v1115_v22, %v688_v24  ;;  %v720_v46 = vld [vmem:[%s1105_s8 + $0xb0] sm:$0xff]  ;;  %835 = vmatpush3.bf16.msra.mxu0 %v1144_v38 }
  0x26   : > { %v380_v28 = vmul.f32 %v1142_v37, %v711_v20  ;;  %v302_v29 = vadd.f32 %v294_v5, %v272_v14  ;;  %v697_v41 = vld [vmem:[%s1105_s8 + $0x200] sm:$0xff]  ;;  %v706_v51 = vld [vmem:[%s1105_s8 + $0x171] sm:$0xff]  ;;  %v413_v53 = vmul.f32 %v1153_v43, %v723_v12  ;;  %v442_v34 = vmul.f32 %v1162_v47, %v732_v15  ;;  %857 = vmatpush3.bf16.msra.mxu1 %v1144_v38 }
  0x27   : > { %v387_v33 = vadd.f32 %v379_v63, %v357_v25  ;;  %v329_v44 = vadd.f32 %v321_v19, %v299_v30  ;;  %v244_v50 = vadd.f32 %v236_v32, %v214_v31  ;;  %v410_v54 = vmul.f32 %v1153_v43, %v720_v46  ;;  %v729_v58 = vld [vmem:[%s1105_s8 + $0x21] sm:$0xff]  ;;  %837 = vmatprep.subr.bf16.mxu0 %v1146_v39  ;;  %v724_v11 = vld [vmem:[%s1105_s8 + $0xf0] sm:$0xff] }
  0x28   : > { %v332_v42 = vadd.f32 %v324_v6, %v302_v29  ;;  %v325_v60 = vmul.f32 %v1120_v23, %v697_v41  ;;  %v354_v62 = vmul.f32 %v1136_v35, %v706_v51  ;;  %v211_v63 = vmul.f32 %v711_v20, %v1089_v17  ;;  %850 = vmatprep.subr.bf16.mxu1 %v1146_v39  ;;  %v685_v4 = vld [vmem:[%s1105_s8 + $0x140] sm:$0xff]  ;;  %v694_v12 = vld [vmem:[%s1105_s8 + $0x1d0] sm:$0xff] }
  0x29   : > { %v417_v52 = vadd.f32 %v409_v0, %v387_v33  ;;  %v358_v57 = vadd.f32 %v350_v27, %v329_v44  ;;  %v273_v59 = vadd.f32 %v265_v36, %v244_v50  ;;  %v439_v5 = vmul.f32 %v1162_v47, %v729_v58  ;;  %v715_v38 = vld [vmem:[%s1105_s8 + $0x60] sm:$0xff]  ;;  %839 = vmatpush3.bf16.msra.mxu0 %v1146_v39  ;;  %v698_v30 = vld [vmem:[%s1105_s8 + $0x210] sm:$0xff] }
  0x2a   : > { %v361_v56 = vadd.f32 %v353_v10, %v332_v42  ;;  %v262_v6 = vmul.f32 %v729_v58, %v1110_v21  ;;  %v384_v10 = vmul.f32 %v1142_v37, %v715_v38  ;;  %858 = vmatpush3.bf16.msra.mxu1 %v1146_v39  ;;  %v414_v13 = vmul.f32 %v1153_v43, %v724_v11  ;;  %v733_v14 = vld [vmem:[%s1105_s8 + $0x61] sm:$0xff]  ;;  %v712_v36 = vld [vmem:[%s1105_s8 + $0x30] sm:$0xff] }
  0x2b   : > { %v446_v61 = vadd.f32 %v438_v1, %v417_v52  ;;  %v388_v2 = vadd.f32 %v380_v28, %v358_v57  ;;  %v303_v3 = vadd.f32 %v295_v40, %v273_v59  ;;  %v233_v1 = vmul.f32 %v720_v46, %v1094_v18  ;;  %v703_v19 = vld [vmem:[%s1105_s8 + $0x141] sm:$0xff]  ;;  %841 = vmatprep.subr.bf16.mxu0 %v1156_v45  ;;  %v730_v44 = vld [vmem:[%s1105_s8 + $0x31] sm:$0xff] }
  0x2c   : > { %v391_v0 = vadd.f32 %v383_v26, %v361_v56  ;;  %v292_v16 = vmul.f32 %v1115_v22, %v685_v4  ;;  %851 = vmatprep.subr.bf16.mxu1 %v1156_v45  ;;  %v443_v25 = vmul.f32 %v1162_v47, %v733_v14  ;;  %v689_v26 = vld [vmem:[%s1105_s8 + $0x180] sm:$0xff]  ;;  %v322_v27 = vmul.f32 %v1120_v23, %v694_v12  ;;  %v716_v58 = vld [vmem:[%s1105_s8 + $0x70] sm:$0xff] }
  0x2d   : > { %800 = vmatprep.mubr.f32.mxu0 %v446_v61  ;;  %v418_v8 = vadd.f32 %v410_v54, %v388_v2  ;;  %v333_v9 = vadd.f32 %v325_v60, %v303_v3  ;;  %v241_v15 = vadd.f32 %v233_v1, %v211_v63  ;;  %v215_v28 = vmul.f32 %v715_v38, %v1089_v17  ;;  %v721_v40 = vld [vmem:[%s1105_s8 + $0xc0] sm:$0xff]  ;;  %v686_v54 = vld [vmem:[%s1105_s8 + $0x150] sm:$0xff] }
  0x2e   : > { %v421_v7 = vadd.f32 %v413_v53, %v391_v0  ;;  %v237_v29 = vmul.f32 %v724_v11, %v1094_v18  ;;  %v351_v33 = vmul.f32 %v1136_v35, %v703_v19  ;;  %v266_v41 = vmul.f32 %v733_v14, %v1110_v21  ;;  %843 = vmatpush3.bf16.msra.mxu0 %v1156_v45  ;;  %v707_v51 = vld [vmem:[%s1105_s8 + $0x181] sm:$0xff] }
  0x2f   : > { %v362_v24 = vadd.f32 %v354_v62, %v333_v9  ;;  %v270_v39 = vadd.f32 %v262_v6, %v241_v15  ;;  %v447_v31 = vadd.f32 %v439_v5, %v418_v8  ;;  %859 = vmatpush3.bf16.msra.mxu1 %v1156_v45  ;;  %v296_v50 = vmul.f32 %v1115_v22, %v689_v26  ;;  %v695_v60 = vld [vmem:[%s1105_s8 + $0x1e0] sm:$0xff]  ;;  %v734_v5 = vld [vmem:[%s1105_s8 + $0x71] sm:$0xff] }
  0x30   : > { %v450_v20 = vadd.f32 %v442_v34, %v421_v7  ;;  %v245_v46 = vadd.f32 %v237_v29, %v215_v28  ;;  %v381_v53 = vmul.f32 %v1142_v37, %v712_v36  ;;  %v326_v34 = vmul.f32 %v1120_v23, %v698_v30  ;;  %v725_v0 = vld [vmem:[%s1105_s8 + $0x100] sm:$0xff]  ;;  %v704_v6 = vld [vmem:[%s1105_s8 + $0x151] sm:$0xff] }
  0x31   : > { %v392_v32 = vadd.f32 %v384_v10, %v362_v24  ;;  %v300_v42 = vadd.f32 %v292_v16, %v270_v39  ;;  %v212_v45 = vmul.f32 %v712_v36, %v1089_v17  ;;  %v234_v59 = vmul.f32 %v721_v40, %v1094_v18  ;;  %801 = vmatmul.mubr.f32.vlgmr.msra.gmra.mrb[0].mxu0 %v447_v31  ;;  %v690_v7 = vld [vmem:[%s1105_s8 + $0x190] sm:$0xff]  ;;  %v699_v16 = vld [vmem:[%s1105_s8 + $0x220] sm:$0xff] }
  0x32   : > { %806 = vmatprep.mubr.f32.mxu1 %v450_v20  ;;  %v274_v57 = vadd.f32 %v266_v41, %v245_v46  ;;  %v411_v62 = vmul.f32 %v1153_v43, %v721_v40  ;;  %v355_v63 = vmul.f32 %v1136_v35, %v707_v51  ;;  %v263_v2 = vmul.f32 %v730_v44, %v1110_v21  ;;  %v708_v30 = vld [vmem:[%s1105_s8 + $0x191] sm:$0xff]  ;;  %v717_v36 = vld [vmem:[%s1105_s8 + $0x80] sm:$0xff] }
  0x33   : > { %v422_v52 = vadd.f32 %v414_v13, %v392_v32  ;;  %v330_v56 = vadd.f32 %v322_v27, %v300_v42  ;;  %v242_v38 = vadd.f32 %v234_v59, %v212_v45  ;;  %v293_v1 = vmul.f32 %v1115_v22, %v686_v54 }
  0x34   : > { %v304_v4 = vadd.f32 %v296_v50, %v274_v57  ;;  %v440_v8 = vmul.f32 %v1162_v47, %v730_v44  ;;  %v385_v9 = vmul.f32 %v1142_v37, %v716_v58  ;;  %v323_v10 = vmul.f32 %v1120_v23, %v695_v60 }
  0x35   : > { %v451_v61 = vadd.f32 %v443_v25, %v422_v52  ;;  %v359_v3 = vadd.f32 %v351_v33, %v330_v56  ;;  %v216_v11 = vmul.f32 %v716_v58, %v1089_v17  ;;  %v271_v14 = vadd.f32 %v263_v2, %v242_v38 }
  0x36   : > { %v334_v13 = vadd.f32 %v326_v34, %v304_v4  ;;  %v238_v15 = vmul.f32 %v725_v0, %v1094_v18  ;;  %v415_v19 = vmul.f32 %v1153_v43, %v725_v0  ;;  %v352_v20 = vmul.f32 %v1136_v35, %v704_v6 }
  0x37   : > { %807 = vmatmul.mubr.f32.vlgmr.msra.gmra.mrb[0].mxu1 %v451_v61  ;;  %v389_v12 = vadd.f32 %v381_v53, %v359_v3  ;;  %v267_v24 = vmul.f32 %v734_v5, %v1110_v21  ;;  %v297_v25 = vmul.f32 %v1115_v22, %v690_v7  ;;  %v301_v27 = vadd.f32 %v293_v1, %v271_v14  ;;  %v735_v53 = vld [vmem:[%s1105_s8 + $0x81] sm:$0xff] }
  0x38   : > { %v363_v39 = vadd.f32 %v355_v63, %v334_v13  ;;  %v246_v17 = vadd.f32 %v238_v15, %v216_v11  ;;  %v444_v28 = vmul.f32 %v1162_v47, %v734_v5  ;;  %v382_v18 = vmul.f32 %v1142_v37, %v1165_v48 }
  0x39   : > { %v419_v26 = vadd.f32 %v411_v62, %v389_v12  ;;  %v327_v29 = vmul.f32 %v1120_v23, %v699_v16  ;;  %v331_v33 = vadd.f32 %v323_v10, %v301_v27  ;;  %v412_v22 = vmul.f32 %v1153_v43, %v1168_v49  ;;  %v726_v23 = vld [vmem:[%s1105_s8 + $0x110] sm:$0xff]  ;;  %s190_s8 = scalar_lea.vmem [#allocation2], %s670_s7 }
  0x3a   : > { %v393_v32 = vadd.f32 %v385_v9, %v363_v39  ;;  %v275_v21 = vadd.f32 %v267_v24, %v246_v17  ;;  %v356_v44 = vmul.f32 %v1136_v35, %v708_v30  ;;  %v441_v48 = vmul.f32 %v1162_v47, %v1176_v55  ;;  %s604_s12 = sshll.u32 %s190_s8, 4  ;;  %s1313_s12 = int_to_ptr.vmem [resolvable:$true] %s604_s12 }
  0x3b   : > { %v448_v31 = vadd.f32 %v440_v8, %v419_v26  ;;  %v360_v41 = vadd.f32 %v352_v20, %v331_v33  ;;  %v386_v52 = vmul.f32 %v1142_v37, %v717_v36  ;;  %v416_v54 = vmul.f32 %v1153_v43, %v726_v23  ;;  %v737_v37 = vld [vmem:[%s1361_s3] ss:$0 sm:$0xff]  ;;  %s902_s20 = scalar_lea.vmem %s1313_s12, 1024  ;;  %p909_p0 = scmp.lt.s32.totalorder %s1313_s12, %s907_s23 }
  0x3c   : > { %v423_v40 = vadd.f32 %v415_v19, %v393_v32  ;;  %v305_v42 = vadd.f32 %v297_v25, %v275_v21  ;;  %v445_v35 = vmul.f32 %v1162_v47, %v735_v53  ;;  %p903_p11 = scmp.ne.s32.totalorder %s1313_s12, %s902_s20  ;;  %p910_p1 = scmp.lt.s32.totalorder %s908_s27, %s902_s20 }
  0x3d   : > { %803 = vmatprep.mubr.f32.mxu0 %v448_v31  ;;  %v390_v50 = vadd.f32 %v382_v18, %v360_v41 }
  0x3e   : > { %v452_v46 = vadd.f32 %v444_v28, %v423_v40  ;;  %v335_v51 = vadd.f32 %v327_v29, %v305_v42  ;;  %p904_p12 = pnand %p903_p11, %p1032_p5  ;;  %p911_p2 = por %p910_p1, %p909_p0 }
  0x3f   : > { %v420_v49 = vadd.f32 %v412_v22, %v390_v50 }
  0x40   : > { %809 = vmatprep.mubr.f32.mxu1 %v452_v46  ;;  %v364_v34 = vadd.f32 %v356_v44, %v335_v51  ;;  %p905_p13 = pneg %p904_p12 }
  0x41   : > { %v449_v56 = vadd.f32 %v441_v48, %v420_v49 }
  0x42   : > { %v394_v57 = vadd.f32 %v386_v52, %v364_v34  ;;  %p912_p3 = pnand %p911_p2, %p905_p13 }
  0x43   : > { %804 = vmatmul.mubr.f32.gmra.mrb[2].mxu0 %v449_v56 }
  0x44   : > { %v424_v55 = vadd.f32 %v416_v54, %v394_v57 }
  0x46   : > { %v453_v58 = vadd.f32 %v445_v35, %v424_v55 }
  0x48   : > { %810 = vmatmul.mubr.f32.gmra.mrb[2].mxu1 %v453_v58 }
 0x104   : > { %v802_v45 = vpop.f32.mrb[0].mxu0 }
 0x105   : > { %v549_v59 = vadd.f32 %v802_v45, %v737_v37  ;;  %v543_v60 = vpop.f32.mrb[1].mxu0 }
 0x106   : > { %v544_v61 = vadd.f32 %v737_v37, %v543_v60 }
 0x107   : > { %583 = vst [vmem:[%s190_s8 + $0x8] sm:$0xff] %v549_v59 }
 0x108   : > { %582 = vst [vmem:[%s190_s8] sm:$0xff] %v544_v61 }
 0x10a   : > { %v808_v43 = vpop.f32.mrb[0].mxu1 }
 0x10b   : > { %v569_v47 = vadd.f32 %v808_v43, %v737_v37  ;;  %v563_v62 = vpop.f32.mrb[1].mxu1 }
 0x10c   : > { %v564_v63 = vadd.f32 %v737_v37, %v563_v62 }
 0x10d   : > { %587 = vst [vmem:[%s190_s8 + $0x28] sm:$0xff] %v569_v47 }
 0x10e   : > { %586 = vst [vmem:[%s190_s8 + $0x20] sm:$0xff] %v564_v63 }
 0x116   : > { %v805_v0 = vpop.f32.mrb[2].mxu0 }
 0x117   : > { %v559_v2 = vadd.f32 %v805_v0, %v737_v37  ;;  %v553_v3 = vpop.f32.mrb[3].mxu0 }
 0x118   : > { %v554_v4 = vadd.f32 %v737_v37, %v553_v3 }
 0x119   : > { %585 = vst [vmem:[%s190_s8 + $0x18] sm:$0xff] %v559_v2 }
 0x11a   : > { %584 = vst [vmem:[%s190_s8 + $0x10] sm:$0xff] %v554_v4 }
 0x11b   : > { %v811_v5 = vpop.f32.mrb[2].mxu1 }
 0x11c   : > { %v579_v38 = vadd.f32 %v811_v5, %v737_v37  ;;  %v573_v1 = vpop.f32.mrb[3].mxu1 }
 0x11d   : > { %v574_v6 = vadd.f32 %v737_v37, %v573_v1 }
 0x11e   : > { %589 = vst [vmem:[%s190_s8 + $0x38] sm:$0xff] %v579_v38 }
 0x11f   : > { %588 = vst [vmem:[%s190_s8 + $0x30] sm:$0xff] %v574_v6 }
 0x120   : > { %915 = shalt.err (!%p912_p3)
}
 0x121   : > { %s916_s28 = scalar_lea.hbm %s1311_s5, 1024  ;;  %s920_s6 = scalar_lea.hbm %s1362_s4, 2048 }
 0x122   : > { %p917_p4 = scmp.ne.s32.totalorder %s1311_s5, %s916_s28  ;;  %p921_p9 = scmp.lt.u32.totalorder %s1311_s5, %s1362_s4 }
 0x123   : > { %p922_p10 = scmp.lt.u32.totalorder %s920_s6, %s916_s28  ;;  %p924_p12 = scmp.lt.u32.totalorder %s916_s28, %s1311_s5 }
 0x124   : > { %p918_p7 = pnand %p917_p4, %p1032_p5 }
 0x125   : > { %p923_p11 = por %p922_p10, %p921_p9 }
 0x126   : > { %p919_p8 = pneg %p918_p7 }
 0x127   : > { %p925_p13 = por %p924_p12, %p923_p11 }
 0x129   : > { %p926_p0 = pnand %p925_p13, %p919_p8 }
 0x12b   : > { %929 = shalt.err (!%p926_p0)
}
 0x12c   : > { %s967_s10 = smov 128   ;;  %s968_s8 = smov 8  }
 0x12d   : > { %861 = dma.vmem_to_hbm [thread:$0]  (%p1032_p5), %s1313_s12, 1024, %s1311_s5, %s1317_s19, %s967_s10, %s967_s10, %s968_s8  }
 0x12e PF: > { %p867_p1 = scmp.ge.s32.totalorder %s964_s18, 2  ;;  %s619_s11 = sand.u32 1, %s952_s15  }
 0x12f   : > { %s620_s14 = scalar_lea.sflag [#allocation3], %s619_s11 }
 0x130   : > { %p864_p2 = pnand %p867_p1, %p1036_p6 }
 0x132   : > { %947 = dma.done.wait (!%p864_p2), %s620_s14, 1024  }
 0x133   : > { %949 = vsyncadd (!%p864_p2), %s620_s14, 4294966272  ;;  %p14_p3 = scmp.ge.s32.totalorder %s1019_s21, 4   ;;  %s1365_s15 = smov %s956_s16 }
 0x134   : > { %s1366_s16 = smov %s960_s17  ;;  %s1367_s17 = smov %s1030_s24 }
 0x135   : > { %s1368_s18 = smov %s1019_s21  ;;  %16 = sbr.rel (!%p14_p3) target bundleno = 3 (0x3), region = 76 }
 0x13c   :  { %625 = vsyncpa [#allocation3], 1 }
 0x13d   :  { %627 = vsyncpa [#allocation3 + $0x1], 1 }

</bundles_post_ra>
